<compile_context>
chip_gen: v5e
topology: v5e:2x2
jax: 0.10.0
libtpu: 0.0.40
codegen_flags: <defaults>
</compile_context>

<pallas_src>
import functools

import numpy as np
import jax
import jax.numpy as jnp
from jax import lax
from jax.experimental import pallas as pl
from jax.experimental.pallas import tpu as pltpu

_LANES = 128


# ----------------------------------------------------------------------------
# Pallas kernel: single-K-block matmul with fused bias + activation epilogue.
#   out = act(x @ w + b); bf16 operands, f32 MXU accumulation, f32 epilogue.
# ----------------------------------------------------------------------------
def _mm_bias_act_kernel(x_ref, w_ref, b_ref, o_ref, *, act):
    y = jnp.dot(x_ref[...], w_ref[...], preferred_element_type=jnp.float32)
    y = y + b_ref[...]                                   # (tm, tn) + (1, tn), f32
    if act == "relu":
        y = jnp.maximum(y, 0.0)
    elif act == "gelu":
        # TODO(synk): tanh approximation; PyTorch nn.GELU default is erf-exact.
        c0 = 0.7978845608028654                          # sqrt(2/pi)
        y = 0.5 * y * (1.0 + jnp.tanh(c0 * (y + 0.044715 * y * y * y)))
    o_ref[...] = y.astype(o_ref.dtype)


def _round_up(v, m):
    return (v + m - 1) // m * m


def _pick_tm(m, cap=512):
    """Largest multiple-of-8 divisor of m (capped) such that m // tm >= 2,
    keeping >= 2 parallel grid points so both v7x TensorCores get work."""
    best = min(m, 8)
    for cand in range(8, min(m // 2, cap) + 1, 8):
        if m % cand == 0:
            best = cand
    return best


def _pad_weight(w_mat, b):
    """w_mat: (K, N) matmul-layout weight, b: (N,).  N is padded to 128 lanes
    (lane-dense stores, good on v5e); K is left UNPADDED because the kernel
    consumes it as one full-extent block.  Weights stored bf16, bias f32."""
    K, N = w_mat.shape
    Np = _round_up(N, _LANES)
    w_p = jnp.pad(w_mat.astype(jnp.float32), ((0, 0), (0, Np - N)))
    b_p = jnp.pad(b.astype(jnp.float32), (0, Np - N)).reshape(1, Np)
    return w_p.astype(jnp.bfloat16), b_p, N


def matmul_bias_act(x, w_p, b_p, n_out, act="none"):
    """x: (M, K) f32, w_p: (K, Np) bf16, b_p: (1, Np) f32 (pre-padded at init).
    Returns act(x @ w + b)[:, :n_out] in f32."""
    M, K = x.shape
    Kw, Np = w_p.shape
    assert K == Kw and b_p.shape == (1, Np)
    Mp = _round_up(M, 8)
    if Mp != M:                                          # never hit in this model
        x = jnp.pad(x, ((0, Mp - M), (0, 0)))
    tm = _pick_tm(Mp)
    tn = _LANES
    grid = (Mp // tm, Np // tn)
    out = pl.pallas_call(
        functools.partial(_mm_bias_act_kernel, act=act),
        out_shape=jax.ShapeDtypeStruct((Mp, Np), jnp.float32),
        grid=grid,
        in_specs=[
            pl.BlockSpec((tm, K), lambda i, j: (i, 0)),   # full-K block, no K pad
            pl.BlockSpec((K, tn), lambda i, j: (0, j)),
            pl.BlockSpec((1, tn), lambda i, j: (0, j)),
        ],
        out_specs=pl.BlockSpec((tm, tn), lambda i, j: (i, j)),
        compiler_params=pltpu.CompilerParams(
            dimension_semantics=("parallel", "parallel")),
    )(x.astype(jnp.bfloat16), w_p, b_p)
    if Mp != M:
        out = out[:M]
    return out[:, :n_out]


def conv1d_bias_act(x_nc, w_p, b_p, n_out, ksize, act):
    """'same'-padded Conv1d(kernel=ksize), channels-last.  x_nc: (B, T, C).
    The im2col is a last-axis concat of shifted views (no 4-D stack/transpose)."""
    # TODO(synk): the ks shifted taps could be folded into the kernel via pl.ds
    # windows, but the per-batch halo handling is not worth it at K = C*ks <= 96.
    B, T, C = x_nc.shape
    pad = ksize // 2
    xp = jnp.pad(x_nc, ((0, 0), (pad, pad), (0, 0))) if pad else x_nc
    cols = jnp.concatenate([xp[:, d:d + T, :] for d in range(ksize)], axis=-1)
    y = matmul_bias_act(cols.reshape(B * T, ksize * C), w_p, b_p, n_out, act=act)
    return y.reshape(B, T, n_out)


# ----------------------------------------------------------------------------
# Non-matmul pieces kept on plain XLA (channels-last layouts).
# ----------------------------------------------------------------------------
def _maxpool1d_nc(x_nc, kernel=3, stride=2, pad=1):
    # TODO(synk): TemporalMaxer (MaxPool1d) via lax.reduce_window.
    return lax.reduce_window(x_nc, -jnp.inf, lax.max,
                             (1, kernel, 1), (1, stride, 1),
                             [(0, 0), (pad, pad), (0, 0)])


def _knn_dis_idx(x_nc, k):
    """knn(type='dis'): top-k of -squared-euclidean pairwise distance.
    x_nc: (B, N, C) -> (B, N, k)."""
    # TODO(synk): neighbour selection uses lax.top_k (no Pallas equivalent).
    sq = jnp.sum(x_nc * x_nc, axis=-1)                     # (B, N)
    inner = jnp.einsum("bmc,bnc->bmn", x_nc, x_nc)
    pd = 2.0 * inner - sq[:, None, :] - sq[:, :, None]     # -||x_m - x_n||^2
    _, idx = lax.top_k(pd, k)
    return idx


def _poincare_embed(x_nc, eps=1e-5):
    """PoincareEmbedding.forward (parameter-free path used by GCNeXt)."""
    sq = jnp.sum(x_nc * x_nc, axis=-1, keepdims=True)
    radius = 1.0 - eps * eps
    magnitude = jnp.sqrt(sq + eps * eps)
    u = x_nc / magnitude
    scale = jnp.sqrt(jnp.maximum(1.0 - sq / (radius * radius), 0.0))  # NaN guard
    return u * scale


def _knn_poi_idx(x_p, k, eps=1e-10):
    """knn(type='poi'): top-k of the reference poincare_distance(x_p, x_p).
    Faithful to the reference: its numerator ||u - v||^2 is per-point (NOT a
    pairwise distance) and u == v here, so it is identically zero."""
    sq = jnp.sum(x_p * x_p, axis=-1)                       # (B, N)
    mag2 = sq + eps * eps
    denom = (1.0 - mag2[:, None, :]) * (1.0 - mag2[:, :, None])
    denom = jnp.where(jnp.abs(denom) < 1e-30, 1e-30, denom)          # NaN guard
    cosh = 1.0 + 2.0 * jnp.zeros_like(denom) / denom
    dist = (1.0 / eps) * jnp.arccosh(jnp.maximum(cosh, 1.0))         # NaN guard
    _, idx = lax.top_k(dist, k)
    return idx


# ----------------------------------------------------------------------------
# GCNeXt module (JAX / Pallas).
# ----------------------------------------------------------------------------
class GCNeXtPallas:
    def __init__(self, channel_in, n_embd, channel_out, n_embd_ks=3, arch=(2, 4),
                 k=(7, 7, 7, 7, 7, 7), groups=32, scale_factor=2, key=None):
        assert channel_out == n_embd, "residual add requires channel_out == n_embd"
        assert n_embd % groups == 0 and channel_out % groups == 0
        assert len(k) >= arch[1]
        self.n_embd = n_embd
        self.n_embd_ks = n_embd_ks
        self.arch = arch
        self.k = k
        self.groups = groups
        self.scale_factor = scale_factor
        if key is None:
            key = jax.random.PRNGKey(0)
        keys = iter(jax.random.split(key, 4 * arch[0] + 8 * arch[1]))

        def init(shape, fan_in, scale=0.1):
            # small deterministic init keeps feature norms < 1 on the Poincare path
            return (scale / np.sqrt(fan_in)) * jax.random.normal(
                next(keys), shape, jnp.float32)

        # embedding Conv1d stack (kernel=n_embd_ks, 'same', bias) + ReLU.
        # Matmul weight rows are tap-major / channel-minor to match the
        # channels-last im2col (cols[..., d*C + c] = x[t + d, c]).
        self.embd = []
        for i in range(arch[0]):
            cin = channel_in if i == 0 else n_embd
            w = init((n_embd, cin, n_embd_ks), cin * n_embd_ks)     # (O, C, ks)
            b = init((n_embd,), cin * n_embd_ks)
            w_mat = jnp.transpose(w, (2, 1, 0)).reshape(n_embd_ks * cin, n_embd)
            self.embd.append(_pad_weight(w_mat, b))

        # per-block params:
        #   TConv1D = 1x1 Conv1d (Pallas matmul + GELU) -> grouped k=5 Conv1d
        #   DConv2D = 1x1 Conv2d (Pallas matmul + GELU) -> grouped 5x5 Conv2d
        self.tconv1, self.tconv2, self.dconv1, self.dconv2 = [], [], [], []
        cpg = n_embd // groups                                       # chans / group
        for _ in range(arch[1]):
            w1 = init((n_embd, n_embd, 1), n_embd)                   # (O, C, 1)
            b1 = init((n_embd,), n_embd)
            self.tconv1.append(_pad_weight(w1.reshape(n_embd, n_embd).T, b1))

            w2 = init((channel_out, cpg, 5), 5 * cpg)                # (O, C/g, 5)
            b2 = init((channel_out,), 5 * cpg)
            self.tconv2.append((jnp.transpose(w2, (2, 1, 0)), b2))   # HIO

            d1 = init((n_embd, 2 * n_embd, 1, 1), 2 * n_embd)        # (O, 2C, 1, 1)
            e1 = init((n_embd,), 2 * n_embd)
            self.dconv1.append(_pad_weight(d1.reshape(n_embd, 2 * n_embd).T, e1))

            d2 = init((channel_out, cpg, 5, 5), 25 * cpg)            # (O, C/g, 5, 5)
            e2 = init((channel_out,), 25 * cpg)
            self.dconv2.append((jnp.transpose(d2, (2, 3, 1, 0)), e2))  # HWIO

    # -- TConv1D: 1x1 conv (+GELU) on the Pallas kernel, then grouped 5-tap conv
    def _tconv(self, i, x_nc):
        B, T, C = x_nc.shape
        w_p, b_p, n_out = self.tconv1[i]
        h = matmul_bias_act(x_nc.reshape(B * T, C), w_p, b_p, n_out, act="gelu")
        h = h.reshape(B, T, n_out)
        w2, b2 = self.tconv2[i]
        y = lax.conv_general_dilated(h, w2, (1,), [(2, 2)],
                                     dimension_numbers=("NHC", "HIO", "NHC"),
                                     feature_group_count=self.groups)
        return y + b2[None, None, :]

    # -- both DConv2D paths (distance-knn + poincare-knn) fused: they share the
    #    same dconv weights, so edge features are concatenated along batch and
    #    run through ONE Pallas matmul and ONE grouped conv.
    def _dconv_pair(self, i, x_nc, idx_dis, idx_poi):
        B, N, C = x_nc.shape
        kk = idx_dis.shape[-1]

        def edge_feat(idx):                                          # style = 0
            feat = jnp.take_along_axis(
                x_nc, idx.reshape(B, N * kk)[..., None], axis=1
            ).reshape(B, N, kk, C)
            center = jnp.broadcast_to(x_nc[:, :, None, :], (B, N, kk, C))
            return jnp.concatenate([feat - center, center], axis=-1)  # (B,N,kk,2C)

        ef = jnp.concatenate([edge_feat(idx_dis), edge_feat(idx_poi)], axis=0)
        w_p, b_p, n_out = self.dconv1[i]
        h = matmul_bias_act(ef.reshape(2 * B * N * kk, 2 * C), w_p, b_p, n_out,
                            act="gelu").reshape(2 * B, N, kk, n_out)
        w2, b2 = self.dconv2[i]
        y = lax.conv_general_dilated(h, w2, (1, 1), [(2, 2), (2, 2)],
                                     dimension_numbers=("NHWC", "HWIO", "NHWC"),
                                     feature_group_count=self.groups)
        y = jnp.max(y + b2[None, None, None, :], axis=2)   # max over k neighbours
        return y[:B], y[B:]

    def __call__(self, x):
        """x: (B, C_in, T) — same interface as the PyTorch module."""
        h = jnp.transpose(x, (0, 2, 1))                    # channels-last, once
        for (w_p, b_p, n_out) in self.embd:                # embedding convs + ReLU
            h = conv1d_bias_act(h, w_p, b_p, n_out, self.n_embd_ks, act="relu")
        out_feat = [h]
        samp = h
        for i in range(self.arch[1]):
            h = _maxpool1d_nc(samp, 3, self.scale_factor, 1)   # TemporalMaxer
            samp = h
            identity = h
            tout = self._tconv(i, h)
            idx_dis = _knn_dis_idx(h, self.k[i])
            x_p = _poincare_embed(h)                       # PoincareEmbedding fwd
            idx_poi = _knn_poi_idx(x_p, self.k[i])
            dout, pout = self._dconv_pair(i, h, idx_dis, idx_poi)
            h = tout + dout + identity + pout
            out_feat.append(h)
        # reshape_feature: centre-pad every scale to T0 along time and sum
        out = out_feat[0]
        t0 = out.shape[1]
        for f in out_feat[1:]:
            tb = f.shape[1]
            lp = (t0 - tb) // 2
            out = out + jnp.pad(f, ((0, 0), (lp, t0 - tb - lp), (0, 0)))
        return jnp.transpose(out, (0, 2, 1))               # back to (B, C, T)


# ----------------------------------------------------------------------------
if __name__ == "__main__":
    # ---- standalone numeric check of the Pallas matmul kernel --------------
    ka, kb = jax.random.split(jax.random.PRNGKey(1))
    A = jax.random.normal(ka, (64, 20), jnp.float32)
    W = jax.random.normal(kb, (20, 33), jnp.float32)
    bias = jnp.linspace(-1.0, 1.0, 33, dtype=jnp.float32)
    w_p, b_p, n_out = _pad_weight(W, bias)

    # reference with the same bf16 operand rounding the kernel uses
    A64 = np.asarray(A.astype(jnp.bfloat16).astype(jnp.float32), np.float64)
    W64 = np.asarray(W.astype(jnp.bfloat16).astype(jnp.float32), np.float64)
    ref = A64 @ W64 + np.asarray(bias, np.float64)

    got_relu = jax.block_until_ready(matmul_bias_act(A, w_p, b_p, n_out, act="relu"))
    np.testing.assert_allclose(np.asarray(got_relu), np.maximum(ref, 0.0),
                               rtol=1e-2, atol=1e-2)

    got_gelu = jax.block_until_ready(matmul_bias_act(A, w_p, b_p, n_out, act="gelu"))
    ref_gelu = 0.5 * ref * (1.0 + np.tanh(0.7978845608028654 *
                                          (ref + 0.044715 * ref ** 3)))
    np.testing.assert_allclose(np.asarray(got_gelu), ref_gelu, rtol=1e-2, atol=1e-2)

    # ---- full GCNeXt forward ------------------------------------------------
    # T = 128 is the smallest power-of-two length that keeps N >= k = 7 after
    # the 4 stride-2 TemporalMaxer stages (128 -> 64 -> 32 -> 16 -> 8).
    B, C_in, T = 2, 4, 128
    n_embd = channel_out = 32
    kx, kw = jax.random.split(jax.random.PRNGKey(0))
    x = jax.random.normal(kx, (B, C_in, T), dtype=jnp.float32)

    model = GCNeXtPallas(C_in, n_embd, channel_out, key=kw)
    out = jax.block_until_ready(jax.jit(model.__call__)(x))

    assert out.shape == (B, n_embd, T), out.shape
    assert bool(jnp.all(jnp.isfinite(out)))
    print("KERNEL_OK")
</pallas_src>

<mosaic_0001>
module attributes {stable_mosaic.version = 11 : i64} {
  func.func @_mm_bias_act_kernel(%arg0: i32, %arg1: i32, %arg2: memref<32x20xbf16, #tpu.memory_space<vmem>>, %arg3: memref<20x128xbf16, #tpu.memory_space<vmem>>, %arg4: memref<1x128xf32, #tpu.memory_space<vmem>>, %arg5: memref<32x128xf32, #tpu.memory_space<vmem>>) attributes {dimension_semantics = [#tpu.dimension_semantics<parallel>, #tpu.dimension_semantics<parallel>], iteration_bounds = array<i64: 2, 1>, scalar_prefetch = 0 : i64, scratch_operands = 0 : i64, tpu.core_type = #tpu.core_type<tc>, window_params = [{transform_indices = @transform_0, window_bounds = array<i64: 32, 20>}, {transform_indices = @transform_1, window_bounds = array<i64: 20, 128>}, {transform_indices = @transform_2, window_bounds = array<i64: 1, 128>}, {transform_indices = @transform_3, window_bounds = array<i64: 32, 128>}]} {
    %c0 = arith.constant 0 : index
    %c0_0 = arith.constant 0 : index
    %0 = vector.load %arg2[%c0, %c0_0] : memref<32x20xbf16, #tpu.memory_space<vmem>>, vector<32x20xbf16>
    %c0_1 = arith.constant 0 : index
    %c0_2 = arith.constant 0 : index
    %1 = vector.load %arg3[%c0_1, %c0_2] : memref<20x128xbf16, #tpu.memory_space<vmem>>, vector<20x128xbf16>
    %cst = arith.constant dense<0.000000e+00> : vector<32x128xf32>
    %2 = tpu.matmul %0, %1, %cst {dimension_numbers = #tpu.dot_dimension_numbers<[1], [0], [0], [1], [0, 0, 1, 1], [], []>} : vector<32x20xbf16>, vector<20x128xbf16>, vector<32x128xf32> -> vector<32x128xf32>
    %c0_3 = arith.constant 0 : index
    %c0_4 = arith.constant 0 : index
    %3 = vector.load %arg4[%c0_3, %c0_4] : memref<1x128xf32, #tpu.memory_space<vmem>>, vector<1x128xf32>
    %4 = vector.broadcast %3 : vector<1x128xf32> to vector<32x128xf32>
    %5 = arith.addf %2, %4 : vector<32x128xf32>
    %cst_5 = arith.constant 0.000000e+00 : f32
    %6 = vector.broadcast %cst_5 : f32 to vector<32x128xf32>
    %7 = arith.maximumf %5, %6 : vector<32x128xf32>
    %c0_6 = arith.constant 0 : index
    %c0_7 = arith.constant 0 : index
    %8 = vector.load %arg5[%c0_6, %c0_7] : memref<32x128xf32, #tpu.memory_space<vmem>>, vector<32x128xf32>
    tpu.vector_store %arg5[%c0_6, %c0_7], %7 {strides = array<i32>} : memref<32x128xf32, #tpu.memory_space<vmem>>, vector<32x128xf32>,
    return
  }
  func.func @transform_0(%arg0: i32, %arg1: i32) -> (i32, i32) {
    %c0_i32 = arith.constant 0 : i32
    %c0_i32_0 = arith.constant 0 : i32
    return %arg0, %c0_i32 : i32, i32
  }
  func.func @transform_1(%arg0: i32, %arg1: i32) -> (i32, i32) {
    %c0_i32 = arith.constant 0 : i32
    %c0_i32_0 = arith.constant 0 : i32
    return %c0_i32, %arg1 : i32, i32
  }
  func.func @transform_2(%arg0: i32, %arg1: i32) -> (i32, i32) {
    %c0_i32 = arith.constant 0 : i32
    %c0_i32_0 = arith.constant 0 : i32
    return %c0_i32, %arg1 : i32, i32
  }
  func.func @transform_3(%arg0: i32, %arg1: i32) -> (i32, i32) {
    %c0_i32 = arith.constant 0 : i32
    return %arg0, %arg1 : i32, i32
  }
}

</mosaic_0001>

<bundles_post_ra>
// kernel: tpu_custom_call.1
= control target key start
LH: loop header
LB: loop body
LE: loop exit
PB: predicated region body
PF: predicated region fallthrough
CT: control target
= control target key end

     0   :  { %8 = vsyncpa [#allocation3], 0  ;;  %s702_s0 = inlined_call_operand.vmem [shape: bf16[64,20], index: 0, kind: input, shape index: {}]   ;;  %s703_s1 = inlined_call_operand.vmem [shape: bf16[20,128], index: 1, kind: input, shape index: {}]   ;;  %s704_s2 = inlined_call_operand.vmem [shape: f32[1,128], index: 2, kind: input, shape index: {}]   ;;  %s705_s3 = inlined_call_operand.hbm [shape: f32[64,128], index: 3, kind: output, shape index: {}]  }
   0x1   :  { %10 = vsyncpa [#allocation3 + $0x1], 0  ;;  %s597_s12 = smov 0   ;;  %s599_s13 = smov 0  }
   0x2   :  { %s601_s14 = smov 0   ;;  %s603_s15 = smov 0  }
   0x3   :  { %s605_s16 = smov 0   ;;  %s607_s17 = smov 0  }
   0x4 LB: > { %s402_s18 = sadd.s32 4294967295, %s573_s17   ;;  %s403_s19 = sadd.s32 4294967294, %s573_s17   ;;  %s573_s17 = sphi %s607_s17, %s16_s17   ;;  %s569_s16 = sphi %s605_s16, %s712_s16   ;;  %s565_s15 = sphi %s603_s15, %s711_s15   ;;  %s561_s14 = sphi %s601_s14, %s710_s14   ;;  %s557_s13 = sphi %s599_s13, %s709_s13   ;;  %s553_s12 = sphi %s597_s12, %s708_s12  }
   0x5   : > { %s28_s20 = sadd.s32 1, %s569_s16  ;;  %s115_s21 = sadd.s32 1, %s561_s14 }
   0x6   : > { %p30_p0 = scmp.ge.s32.totalorder %s28_s20, 2  ;;  %p125_p1 = scmp.ne.s32.totalorder %s561_s14, %s557_s13 }
   0x7   : > { %p126_p2 = scmp.eq.s32.totalorder %s402_s18, 1  ;;  %p131_p3 = scmp.ne.s32.totalorder %s557_s13, %s553_s12 }
   0x8   : > { %s714_s20 = smov (%p30_p0, %s28_s20), 0  ;;  %p132_p5 = scmp.eq.s32.totalorder %s403_s19, 1 }
   0x9   : > { %p637_p4 = por %p126_p2, %p125_p1  ;;  %s110_s23 = ssub.s32 %s569_s16, %s714_s20 }
   0xa   : > { %p408_p6 = scmp.ge.s32.totalorder %s573_s17, 1  ;;  %p113_p7 = scmp.eq.s32.totalorder %s110_s23, 0 }
   0xb   : > { %p644_p8 = por %p132_p5, %p131_p3  ;;  %p172_p9 = scmp.lt.s32.totalorder %s573_s17, 3 }
   0xc   : > { %s650_s25 = scalar_select %p113_p7, %s561_s14, %s115_s21  }
   0xd   : > { %p173_p10 = pnand %p408_p6, %p172_p9 }
   0xe   : > { %s410_s28 = sshll.u32 (!%p173_p10), %s565_s15, 2  ;;  %s200_s8 = sand.u32 (!%p173_p10), 1, %s557_s13  }
   0xf   : > { %176 = sbr.rel (%p173_p10) target bundleno = 176 (0xb0), region = 32  ;;  %p204_p11 = scmp.lt.s32.totalorder (!%p173_p10), %s410_s28, 7 }
  0x10   : > { %s409_s11 = sshll.u32 (!%p173_p10), %s200_s8, 5  ;;  %s434_s18 = sshll.u32 (!%p173_p10), %s565_s15, 5 }
  0x11   : > { %s202_s19 = scalar_lea.vmem (!%p173_p10), [#allocation2], %s409_s11  ;;  %s299_s26 = scalar_lea.hbm (!%p173_p10), %s705_s3, %s434_s18 }
  0x12   : > { %s300_s27 = sshll.u32 (!%p173_p10), %s202_s19, 4  ;;  %s287_s15 = scalar_lea.sflag (!%p173_p10), [#allocation3], %s200_s8  ;;  %s301_s27 = int_to_ptr.vmem [resolvable:$true] %s300_s27 }
  0x13   : > { %s515_s6 = scalar_lea.hbm (!%p173_p10), %s705_s3, 64 }
  0x14   : > { %v224_v0 = vld [vmem:[%s703_s1 + $0x8] sm:$0x3]  ;;  %vm255_vm0 = vcmask 1041408   ;;  %s716_s28 = smov (!%p204_p11, %s410_s28), 7  ;;  %v433_v4 = vld [vmem:[%s703_s1] sm:$0xff]  ;;  %vm248_vm1 = vcmask 162816  }
  0x15   : > { %v244_v1 = vunpack.c.l.b16 %v224_v0  ;;  %s411_s29 = sshll.u32 %s716_s28, 2  ;;  %v494_v7 = vld [vmem:[%s704_s2] ss:$0 sm:$0xff]  ;;  %s302_s28 = sshll.u32 %s299_s26, 4  ;;  %s303_s28 = int_to_ptr.hbm [resolvable:$true] %s302_s28 }
  0x16   : > { %s207_s7 = scalar_lea.vmem %s702_s0, %s411_s29  ;;  %s509_s29 = sshra.s32 %s303_s28, 4  ;;  %s510_s29 = int_to_ptr.hbm [resolvable:$true] %s509_s29 }
  0x17   : > { %v246_v2 = vpack.c.b16 %v244_v1, %v244_v1  ;;  %v431_v5 = vld [vmem:[%s207_s7] sm:$0xff]  ;;  %v432_v6 = vld [vmem:[%s207_s7 + $0x8] sm:$0xff]  ;;  %s511_s30 = scalar_lea.hbm %s510_s29, 32  ;;  %p516_p1 = scmp.lt.s32.totalorder %s510_s29, %s705_s3 }
  0x18   : > { %p512_p12 = scmp.ne.s32.totalorder %s510_s29, %s511_s30  ;;  %p517_p2 = scmp.lt.s32.totalorder %s515_s6, %s511_s30 }
  0x19   : > { %v257_v3 = vsel %vm255_vm0, %v246_v2, 0 }
  0x1a   : > { %265 = vmatpush.bf16.msra.mxu0 %v257_v3  ;;  %435 = vmatpush.bf16.msra.mxu1 %v257_v3  ;;  %p513_p13 = pnand %p512_p12, %p637_p4  ;;  %p518_p3 = por %p517_p2, %p516_p1 }
  0x1c   : > { %p514_p0 = pneg %p513_p13 }
  0x1e   : > { %266 = vmatpush.bf16.msra.mxu0 %v433_v4  ;;  %436 = vmatpush.bf16.msra.mxu1 %v433_v4  ;;  %p519_p5 = pnand %p518_p3, %p514_p0 }
  0x21   : > { %424 = vmatmul.msk.bf16.vlgmr.msra.gmra.mxu0 %vm248_vm1, %v431_v5  ;;  %425 = vmatmul.msk.bf16.vlgmr.msra.gmra.mxu1 %vm248_vm1, %v432_v6 }
  0x9e   : > { %v268_v8 = vpop.f32.mrf.mxu0  ;;  %v273_v9 = vpop.f32.mrf.mxu1 }
  0x9f   : > { %v269_v10 = vadd.f32 %v494_v7, %v268_v8  ;;  %v274_v11 = vadd.f32 %v494_v7, %v273_v9 }
  0xa1   : > { %v278_v12 = vmax.f32 %v269_v10, 0.0  ;;  %v280_v13 = vmax.f32 %v274_v11, 0.0 }
  0xa3   : > { %282 = vst [vmem:[%s202_s19] sm:$0xff] %v278_v12 }
  0xa4   : > { %284 = vst [vmem:[%s202_s19 + $0x10] sm:$0xff] %v280_v13 }
  0xa6   : > { %v270_v14 = vpop.f32.mrf.mxu0  ;;  %v275_v15 = vpop.f32.mrf.mxu1 }
  0xa7   : > { %v271_v16 = vadd.f32 %v494_v7, %v270_v14  ;;  %v276_v17 = vadd.f32 %v494_v7, %v275_v15 }
  0xa9   : > { %v279_v18 = vmax.f32 %v271_v16, 0.0  ;;  %v281_v19 = vmax.f32 %v276_v17, 0.0 }
  0xab   : > { %283 = vst [vmem:[%s202_s19 + $0x8] sm:$0xff] %v279_v18 }
  0xac   : > { %285 = vst [vmem:[%s202_s19 + $0x18] sm:$0xff] %v281_v19 }
  0xad   : > { %522 = shalt.err (!%p519_p5)
}
  0xae   : > { %s575_s8 = smov 128   ;;  %s576_s10 = smov 8  }
  0xaf   : > { %437 = dma.vmem_to_hbm [thread:$0]  (%p637_p4), %s301_s27, 512, %s303_s28, %s287_s15, %s575_s8, %s575_s8, %s576_s10  }
  0xb0 PF: > { %p443_p6 = scmp.ge.s32.totalorder %s573_s17, 2  ;;  %s317_s11 = sand.u32 1, %s553_s12  }
  0xb1   : > { %s318_s18 = scalar_lea.sflag [#allocation3], %s317_s11 }
  0xb2   : > { %p440_p7 = pnand %p443_p6, %p644_p8 }
  0xb4   : > { %p441_p9 = pneg %p440_p7 }
  0xb6   : > { %548 = dma.done.wait (%p441_p9), %s318_s18, 512  }
  0xb7   : > { %550 = vsyncadd (%p441_p9), %s318_s18, 4294966784  ;;  %s16_s17 = sadd.s32 1, %s573_s17   ;;  %s708_s12 = smov %s557_s13 }
  0xb8   : > { %p13_p10 = scmp.ge.s32.totalorder %s16_s17, 4   ;;  %s709_s13 = smov %s561_s14 }
  0xb9   : > { %s710_s14 = smov %s650_s25  ;;  %s711_s15 = smov %s569_s16 }
  0xba   : > { %s712_s16 = smov %s714_s20  ;;  %15 = sbr.rel (!%p13_p10) target bundleno = 4 (0x4), region = 73 }
  0xbf   :  { %324 = vsyncpa [#allocation3], 1 }
  0xc0   :  { %326 = vsyncpa [#allocation3 + $0x1], 1 }

</bundles_post_ra>
